<compile_context>
chip_gen: v7x
topology: tpu7x:2x2x1
jax: 0.10.0
libtpu: 0.0.40
codegen_flags: <defaults>
</compile_context>

<pallas_src>
import math

import numpy as np

import jax
import jax.numpy as jnp
from jax.experimental import pallas as pl
from jax.experimental.pallas import tpu as pltpu


# ---------------------------------------------------------------- helpers ---

def _make_dct_basis(pix_rows, H, W, bs, nf):
    """(pix_rows, nH*nW*nf) matrix CB so that  flat_chan0_pixels @ CB == DCT features.

    Column (i*nW + j)*nf + k holds, for every pixel of complete block (i, j),
        cos(2*pi*(u*x + v*y)/bs) / bs   with u = k // bs, v = k % bs,
    which is Re(2-D ortho FFT)[u, v] of that block (== torch_dct_2d, flatten()[:nf]).
    Pixels of partial edge blocks (and, in the CHW fallback, of channels > 0) stay 0,
    matching the PyTorch loop that skips incomplete blocks and uses img_tensor[0] only.
    """
    nH, nW = H // bs, W // bs
    din = nH * nW * nf
    m = np.zeros((pix_rows, din), np.float32)
    t = np.arange(bs, dtype=np.float64)
    for k in range(nf):
        u, v = divmod(k, bs)
        blk = np.cos(2.0 * np.pi * (u * t[:, None] + v * t[None, :]) / bs) / bs  # (bs, bs)
        for i in range(nH):
            for j in range(nW):
                col = (i * nW + j) * nf + k
                for x in range(bs):
                    row0 = (i * bs + x) * W + j * bs
                    m[row0:row0 + bs, col] = blk[x]
    return jnp.asarray(m)


def _pick_batch_tile(B, pix, budget_bytes=4 << 20, max_tile=512):
    """Images processed per grid step.

    The block's second-to-last dim must be a multiple of 8 or equal the full batch
    extent; keep the double-buffered pixel slab (tb * pix * 4 B) a few MiB so tiles fit
    comfortably in VMEM on all chips (v7x has 64 MiB physical).
    """
    cap = min(max_tile, max(8, budget_bytes // (pix * 4)))
    if B <= cap:
        return B                      # block == full batch extent -> always legal
    return max(8, (cap // 8) * 8)     # multiple of 8; partial last tile is fine


# ----------------------------------------------------------------- kernel ---

def _fused_kernel(x_ref, cb_ref, wt_ref, bias_ref, out_ref):
    # (tb, pix) channel-0 pixels -> (tb, Din) per-block DCT features (one MXU matmul).
    feats = jnp.dot(x_ref[...], cb_ref[...], preferred_element_type=jnp.float32)
    # dim_reduction: (tb, Din) @ (Din, Dout) + bias.
    out = jnp.dot(feats, wt_ref[...], preferred_element_type=jnp.float32)
    out_ref[...] = (out + bias_ref[...]).astype(out_ref.dtype)


# ------------------------------------------------------------------ public --

def dct_feature_extractor(imgs, weight, bias, block_size=8, num_features=4):
    """imgs: (B, C, H, W). weight: (Dout, Din), bias: (Dout,). Returns (B, Dout)."""
    B, C, H, W = imgs.shape
    bs, nf = block_size, num_features
    if not (1 <= nf <= bs * bs):
        raise ValueError("num_features must be in [1, block_size**2]")
    nH, nW = H // bs, W // bs
    assert nH >= 1 and nW >= 1, "image smaller than one block"
    Dout, Din = weight.shape
    assert Din == nH * nW * nf, (Din, nH * nW * nf)

    HW, CHW = H * W, C * H * W
    # Read only channel 0 when a narrow column block satisfies the (8,128) rule;
    # otherwise fall back to the whole flattened row (CB rows for channels > 0 are 0).
    slice_chan0 = (HW % 128 == 0) and C > 1
    pix = HW if slice_chan0 else CHW

    x2d = imgs.reshape(B, CHW)                              # layout-free flatten of NCHW
    if x2d.dtype != jnp.float32:
        x2d = x2d.astype(jnp.float32)
    cb = _make_dct_basis(pix, H, W, bs, nf)                 # (pix, Din)  VMEM-resident
    wt = weight.T.astype(jnp.float32)                       # (Din, Dout) VMEM-resident
    b2 = bias.astype(jnp.float32).reshape(1, Dout)          # (1, Dout)   VMEM-resident

    tb = _pick_batch_tile(B, pix)

    out = pl.pallas_call(
        _fused_kernel,
        out_shape=jax.ShapeDtypeStruct((B, Dout), jnp.float32),
        grid=(pl.cdiv(B, tb),),
        in_specs=[
            pl.BlockSpec((tb, pix), lambda i: (i, 0)),      # channel-0 pixel slab
            pl.BlockSpec((pix, Din), lambda i: (0, 0)),     # DCT cosine basis
            pl.BlockSpec((Din, Dout), lambda i: (0, 0)),    # dim_reduction weight^T
            pl.BlockSpec((1, Dout), lambda i: (0, 0)),      # bias
        ],
        out_specs=pl.BlockSpec((tb, Dout), lambda i: (i, 0)),
        compiler_params=pltpu.CompilerParams(
            dimension_semantics=("parallel",),              # batch tiles across cores
        ),
    )(x2d, cb, wt, b2)
    return out


# -------------------------------------------------------- pure-JAX reference

def reference(imgs, weight, bias, block_size=8, num_features=4):
    B = imgs.shape[0]
    rows = []
    for b in range(B):
        img = imgs[b, 0]
        H, W = img.shape
        fl = []
        for i in range(0, H - block_size + 1, block_size):
            for j in range(0, W - block_size + 1, block_size):
                blk = img[i:i + block_size, j:j + block_size]
                d = jnp.fft.fft(jnp.fft.fft(blk, axis=0, norm='ortho'),
                                axis=1, norm='ortho').real
                fl.append(d.reshape(-1)[:num_features])
        rows.append(jnp.concatenate(fl))
    feats = jnp.stack(rows)
    return feats @ weight.T + bias


# ------------------------------------------------------------------- main ---

if __name__ == "__main__":
    key = jax.random.PRNGKey(0)
    k_img, k_w, k_b = jax.random.split(key, 3)

    B, C, H, W = 2, 4, 16, 16
    block_size, num_features = 8, 4
    input_dim = (H // block_size) * (W // block_size) * num_features   # 16
    output_dim = 8

    imgs = jax.random.normal(k_img, (B, C, H, W), dtype=jnp.float32)
    bound = 1.0 / math.sqrt(input_dim)
    weight = jax.random.uniform(k_w, (output_dim, input_dim), jnp.float32, -bound, bound)
    bias = jax.random.uniform(k_b, (output_dim,), jnp.float32, -bound, bound)

    out = dct_feature_extractor(imgs, weight, bias, block_size, num_features)
    out = jax.block_until_ready(out)

    ref = reference(imgs, weight, bias, block_size, num_features)
    assert out.shape == (B, output_dim), out.shape
    assert jnp.allclose(out, ref, atol=1e-3, rtol=1e-3), (out, ref)
    print("KERNEL_OK")
</pallas_src>

<mosaic_0001>
module attributes {stable_mosaic.version = 11 : i64} {
  func.func @_fused_kernel(%arg0: i32, %arg1: memref<2x256xf32, #tpu.memory_space<vmem>>, %arg2: memref<256x16xf32, #tpu.memory_space<vmem>>, %arg3: memref<16x8xf32, #tpu.memory_space<vmem>>, %arg4: memref<1x8xf32, #tpu.memory_space<vmem>>, %arg5: memref<2x8xf32, #tpu.memory_space<vmem>>) attributes {dimension_semantics = [#tpu.dimension_semantics<parallel>], iteration_bounds = array<i64: 1>, scalar_prefetch = 0 : i64, scratch_operands = 0 : i64, tpu.core_type = #tpu.core_type<tc>, window_params = [{transform_indices = @transform_0, window_bounds = array<i64: 2, 256>}, {pipeline_mode = #tpu.pipeline_mode<synchronous>, transform_indices = @transform_1, window_bounds = array<i64: 256, 16>}, {pipeline_mode = #tpu.pipeline_mode<synchronous>, transform_indices = @transform_2, window_bounds = array<i64: 16, 8>}, {pipeline_mode = #tpu.pipeline_mode<synchronous>, transform_indices = @transform_3, window_bounds = array<i64: 1, 8>}, {transform_indices = @transform_4, window_bounds = array<i64: 2, 8>}]} {
    %c0 = arith.constant 0 : index
    %c0_0 = arith.constant 0 : index
    %0 = vector.load %arg1[%c0, %c0_0] : memref<2x256xf32, #tpu.memory_space<vmem>>, vector<2x256xf32>
    %c0_1 = arith.constant 0 : index
    %c0_2 = arith.constant 0 : index
    %1 = vector.load %arg2[%c0_1, %c0_2] : memref<256x16xf32, #tpu.memory_space<vmem>>, vector<256x16xf32>
    %cst = arith.constant dense<0.000000e+00> : vector<2x16xf32>
    %2 = tpu.matmul %0, %1, %cst {dimension_numbers = #tpu.dot_dimension_numbers<[1], [0], [0], [1], [0, 0, 1, 1], [], []>} : vector<2x256xf32>, vector<256x16xf32>, vector<2x16xf32> -> vector<2x16xf32>
    %c0_3 = arith.constant 0 : index
    %c0_4 = arith.constant 0 : index
    %3 = vector.load %arg3[%c0_3, %c0_4] : memref<16x8xf32, #tpu.memory_space<vmem>>, vector<16x8xf32>
    %cst_5 = arith.constant dense<0.000000e+00> : vector<2x8xf32>
    %4 = tpu.matmul %2, %3, %cst_5 {dimension_numbers = #tpu.dot_dimension_numbers<[1], [0], [0], [1], [0, 0, 1, 1], [], []>} : vector<2x16xf32>, vector<16x8xf32>, vector<2x8xf32> -> vector<2x8xf32>
    %c0_6 = arith.constant 0 : index
    %c0_7 = arith.constant 0 : index
    %5 = vector.load %arg4[%c0_6, %c0_7] : memref<1x8xf32, #tpu.memory_space<vmem>>, vector<1x8xf32>
    %6 = vector.broadcast %5 : vector<1x8xf32> to vector<2x8xf32>
    %7 = arith.addf %4, %6 : vector<2x8xf32>
    %c0_8 = arith.constant 0 : index
    %c0_9 = arith.constant 0 : index
    %8 = vector.load %arg5[%c0_8, %c0_9] : memref<2x8xf32, #tpu.memory_space<vmem>>, vector<2x8xf32>
    tpu.vector_store %arg5[%c0_8, %c0_9], %7 {strides = array<i32>} : memref<2x8xf32, #tpu.memory_space<vmem>>, vector<2x8xf32>,
    return
  }
  func.func @transform_0(%arg0: i32) -> (i32, i32) {
    %c0_i32 = arith.constant 0 : i32
    %c0_i32_0 = arith.constant 0 : i32
    return %arg0, %c0_i32 : i32, i32
  }
  func.func @transform_1(%arg0: i32) -> (i32, i32) {
    %c0_i32 = arith.constant 0 : i32
    %c0_i32_0 = arith.constant 0 : i32
    %c0_i32_1 = arith.constant 0 : i32
    return %c0_i32, %c0_i32_0 : i32, i32
  }
  func.func @transform_2(%arg0: i32) -> (i32, i32) {
    %c0_i32 = arith.constant 0 : i32
    %c0_i32_0 = arith.constant 0 : i32
    %c0_i32_1 = arith.constant 0 : i32
    return %c0_i32, %c0_i32_0 : i32, i32
  }
  func.func @transform_3(%arg0: i32) -> (i32, i32) {
    %c0_i32 = arith.constant 0 : i32
    %c0_i32_0 = arith.constant 0 : i32
    %c0_i32_1 = arith.constant 0 : i32
    return %c0_i32, %c0_i32_0 : i32, i32
  }
  func.func @transform_4(%arg0: i32) -> (i32, i32) {
    %c0_i32 = arith.constant 0 : i32
    %c0_i32_0 = arith.constant 0 : i32
    return %arg0, %c0_i32 : i32, i32
  }
}

</mosaic_0001>

<bundles_post_ra>
// kernel: tpu_custom_call.1
= control target key start
LH: loop header
LB: loop body
LE: loop exit
PB: predicated region body
PF: predicated region fallthrough
CT: control target
= control target key end

     0   :  { %s491_s0 = inlined_call_operand.vmem [shape: f32[2,1024], index: 0, kind: input, shape index: {}]   ;;  %s492_s1 = inlined_call_operand.vmem [shape: f32[256,16], index: 1, kind: input, shape index: {}]   ;;  %s493_s2 = inlined_call_operand.vmem [shape: f32[16,8], index: 2, kind: input, shape index: {}]   ;;  %s494_s3 = inlined_call_operand.vmem [shape: f32[1,8], index: 3, kind: input, shape index: {}]   ;;  %s495_s4 = inlined_call_operand.hbm [shape: f32[2,8], index: 4, kind: output, shape index: {}]  }
   0x1   :  { %v35_v0 = vld [vmem:[%s492_s1 + $0x80] sm:$0xff]  ;;  %v36_v1 = vld [vmem:[%s492_s1 + $0x88] sm:$0xff]  ;;  %v37_v5 = vld [vmem:[%s492_s1 + $0x90] sm:$0xff] }
   0x2   :  { %v19_v2 = vld [vmem:[%s492_s1] sm:$0xff]  ;;  %v279_v3 = vpack.c.bf16 %v36_v1, %v35_v0  ;;  %v20_v4 = vld [vmem:[%s492_s1 + $0x8] sm:$0xff]  ;;  %v38_v6 = vld [vmem:[%s492_s1 + $0x98] sm:$0xff] }
   0x3   :  { %v281_v7 = vpack.c.bf16 %v20_v4, %v19_v2  ;;  %v283_v8 = vpack.c.bf16 %v38_v6, %v37_v5  ;;  %v21_v9 = vld [vmem:[%s492_s1 + $0x10] sm:$0xff]  ;;  %v22_v10 = vld [vmem:[%s492_s1 + $0x18] sm:$0xff]  ;;  %v39_v11 = vld [vmem:[%s492_s1 + $0xa0] sm:$0xff] }
   0x4   :  { %280 = vmatprep.subr.bf16.mxu0 %v279_v3  ;;  %v40_v12 = vld [vmem:[%s492_s1 + $0xa8] sm:$0xff]  ;;  %v285_v13 = vpack.c.bf16 %v22_v10, %v21_v9  ;;  %v23_v15 = vld [vmem:[%s492_s1 + $0x20] sm:$0xff]  ;;  %v41_v17 = vld [vmem:[%s492_s1 + $0xb0] sm:$0xff] }
   0x5   :  { %282 = vmatpush3.bf16.msra.mxu0 %v281_v7  ;;  %v287_v14 = vpack.c.bf16 %v40_v12, %v39_v11  ;;  %v24_v16 = vld [vmem:[%s492_s1 + $0x28] sm:$0xff]  ;;  %v42_v18 = vld [vmem:[%s492_s1 + $0xb8] sm:$0xff]  ;;  %v25_v21 = vld [vmem:[%s492_s1 + $0x30] sm:$0xff] }
   0x6   :  { %284 = vmatprep.subr.bf16.mxu0 %v283_v8  ;;  %v289_v19 = vpack.c.bf16 %v24_v16, %v23_v15  ;;  %v291_v20 = vpack.c.bf16 %v42_v18, %v41_v17  ;;  %v26_v22 = vld [vmem:[%s492_s1 + $0x38] sm:$0xff]  ;;  %v43_v23 = vld [vmem:[%s492_s1 + $0xc0] sm:$0xff]  ;;  %v44_v24 = vld [vmem:[%s492_s1 + $0xc8] sm:$0xff] }
   0x7   :  { %v231_v25 = vld.sshfl [vmem:[%s491_s0] sm:$0x33 pattern:$0x76325410] }
   0x8   :  { %v59_v26 = vcombine.high %v231_v25, %v231_v25 }
   0x9   :  { %286 = vmatpush3.bf16.msra.mxu0 %v285_v13 }
   0xa   :  { %288 = vmatprep.subr.bf16.mxu0 %v287_v14 }
   0xb   :  { %9 = vsyncpa [#allocation3], 0  ;;  %v293_v27 = vpack.c.bf16 %v26_v22, %v25_v21  ;;  %v295_v28 = vpack.c.bf16 %v44_v24, %v43_v23  ;;  %v27_v29 = vld [vmem:[%s492_s1 + $0x40] sm:$0xff]  ;;  %v28_v30 = vld [vmem:[%s492_s1 + $0x48] sm:$0xff]  ;;  %126 = vmatprep.mubr.f32.mxu0 %v59_v26  ;;  %v342_v53 = vmov 0.0|0.0   ;;  %vm343_vm0 = vmmov 0  }
   0xc   :  { %v45_v31 = vld [vmem:[%s492_s1 + $0xd0] sm:$0xff]  ;;  %v46_v32 = vld [vmem:[%s492_s1 + $0xd8] sm:$0xff]  ;;  %v297_v33 = vpack.c.bf16 %v28_v30, %v27_v29  ;;  %v47_v37 = vld [vmem:[%s492_s1 + $0xe0] sm:$0xff]  ;;  %311 = vmatprep.subr.bf16.mxu1 %v342_v53  ;;  %v344_v54 = vmov 0.0   ;;  %vm141_vm1 = vcmask 130048   ;;  %s345_s0 = smov [#allocation2]  }
   0xd   :  { %290 = vmatpush3.bf16.msra.mxu0 %v289_v19  ;;  %v299_v34 = vpack.c.bf16 %v46_v32, %v45_v31  ;;  %v29_v35 = vld [vmem:[%s492_s1 + $0x50] sm:$0xff]  ;;  %v30_v36 = vld [vmem:[%s492_s1 + $0x58] sm:$0xff]  ;;  %v48_v38 = vld [vmem:[%s492_s1 + $0xe8] sm:$0xff]  ;;  %276 = vmatprep.mubr.msk.f32.mxu1 %vm343_vm0, %v344_v54  ;;  %s223_s7 = sshll.u32 %s345_s0, 4  ;;  %vm215_vm2 = vcmask 58368   ;;  %s224_s7 = int_to_ptr.vmem [resolvable:$true] %s223_s7 }
   0xe   :  { %292 = vmatprep.subr.bf16.mxu0 %v291_v20  ;;  %v301_v39 = vpack.c.bf16 %v30_v36, %v29_v35  ;;  %v303_v40 = vpack.c.bf16 %v48_v38, %v47_v37  ;;  %v31_v41 = vld [vmem:[%s492_s1 + $0x60] sm:$0xff]  ;;  %v32_v42 = vld [vmem:[%s492_s1 + $0x68] sm:$0xff]  ;;  %v49_v43 = vld [vmem:[%s492_s1 + $0xf0] sm:$0xff]  ;;  %p323_p1 = scmp.lt.s32.totalorder %s224_s7, %s224_s7 }
   0xf   :  { %v50_v44 = vld [vmem:[%s492_s1 + $0xf8] sm:$0xff]  ;;  %v305_v45 = vpack.c.bf16 %v32_v42, %v31_v41  ;;  %v33_v47 = vld [vmem:[%s492_s1 + $0x70] sm:$0xff]  ;;  %v132_v50 = vld [vmem:[%s493_s2] sm:$0xff] }
  0x10   :  { %v307_v46 = vpack.c.bf16 %v50_v44, %v49_v43  ;;  %v34_v48 = vld [vmem:[%s492_s1 + $0x78] sm:$0xff]  ;;  %v133_v51 = vld [vmem:[%s493_s2 + $0x8] sm:$0xff]  ;;  %v232_v58 = vld [vmem:[%s494_s3] ss:$0 sm:$0xff]  ;;  %s318_s2 = scalar_lea.vmem %s224_s7, 32 }
  0x11   :  { %294 = vmatpush3.bf16.msra.mxu0 %v293_v27  ;;  %v309_v49 = vpack.c.bf16 %v34_v48, %v33_v47  ;;  %v312_v52 = vpack.c.bf16 %v133_v51, %v132_v50  ;;  %p319_p0 = scmp.ne.s32.totalorder %s224_s7, %s318_s2  ;;  %p324_p2 = scmp.lt.s32.totalorder %s318_s2, %s318_s2 }
  0x12   :  { %296 = vmatprep.subr.bf16.mxu0 %v295_v28 }
  0x13   :  { %313 = vmatpush3.bf16.msra.mxu1 %v312_v52  ;;  %p325_p3 = por %p324_p2, %p323_p1 }
  0x15   :  { %298 = vmatpush3.bf16.msra.mxu0 %v297_v33  ;;  %p326_p4 = pnand %p325_p3, %p319_p0 }
  0x16   :  { %300 = vmatprep.subr.bf16.mxu0 %v299_v34 }
  0x19   :  { %302 = vmatpush3.bf16.msra.mxu0 %v301_v39 }
  0x1a   :  { %304 = vmatprep.subr.bf16.mxu0 %v303_v40 }
  0x1d   :  { %306 = vmatpush3.bf16.msra.mxu0 %v305_v45 }
  0x1e   :  { %308 = vmatprep.subr.bf16.mxu0 %v307_v46 }
  0x21   :  { %310 = vmatpush3.bf16.msra.mxu0 %v309_v49 }
  0x24   :  { %127 = vmatmul.mubr.f32.vlgmr.msra.gmra.mrb[0].mxu0 %v231_v25 }
  0xf7   :  { %v266_v55 = vpop.f32.mrb[0].mxu0 }
  0xf8   :  { %v267_v56 = vpop.f32.mrb[1].mxu0 }
  0xf9   :  { %v268_v57 = vadd.f32 %v267_v56, %v266_v55 }
  0xfb   :  { %277 = vmatmul.mubr.msk.f32.vlgmr.msra.gmra.mrb[0].mxu1 %vm141_vm1, %v268_v57 }
 0x1ce   :  { %v211_v59 = vpop.f32.mrb[0].mxu1 }
 0x1cf   :  { %v212_v60 = vadd.f32 %v232_v58, %v211_v59  ;;  %v278_v61 = vpop.f32.mrb[1].mxu1 }
 0x1d1   :  { %216 = vst.msk [vmem:[#allocation2] sm:$0x3] %vm215_vm2, %v212_v60 }
 0x1d2   :  { %329 = shalt.err (!%p326_p4)
}
 0x1d3   :  { %s330_s10 = scalar_lea.hbm %s495_s4, 32 }
 0x1d4   :  { %p331_p5 = scmp.ne.s32.totalorder %s495_s4, %s330_s10  ;;  %p334_p6 = scmp.lt.u32.totalorder %s330_s10, %s495_s4 }
 0x1d6   :  { %p336_p7 = pnand %p334_p6, %p331_p5 }
 0x1d8   :  { %339 = shalt.err (!%p336_p7)
}
 0x1d9   :  { %226 = dma.vmem_to_hbm [thread:$0]  %s224_s7, 32, %s495_s4, [#allocation3]  }
 0x1da   :  { %340 = dma.done.wait [#allocation3], 32  }
 0x1db   :  { %341 = vsyncadd [#allocation3], 4294967264 }
 0x1dc   :  { %230 = vsyncpa [#allocation3], 1 }

</bundles_post_ra>
